<compile_context>
chip_gen: v5e
topology: v5e:2x2
jax: 0.10.0
libtpu: 0.0.40
codegen_flags: <defaults>
</compile_context>

<pallas_src>
import jax
import jax.numpy as jnp
from jax.experimental import pallas as pl
from jax.experimental.pallas import tpu as pltpu

_LANES = 128


def _soft_boundary_kernel(params_ref, dist_ref, out_ref, acc_ref):
    # params (SMEM): [R^2, 1/nu, 1/N]
    i = pl.program_id(0)

    @pl.when(i == 0)
    def _init():
        acc_ref[...] = jnp.zeros_like(acc_ref)

    rsq = params_ref[0]
    x = dist_ref[...].astype(jnp.float32)          # stream native dtype, upcast in-kernel
    acc_ref[...] += jnp.maximum(x - rsq, 0.0)      # scalar immediate hinge: one vmax/vreg

    @pl.when(i == pl.num_programs(0) - 1)
    def _finalize():
        inv_nu = params_ref[1]
        inv_n = params_ref[2]
        out_ref[0, 0] = rsq + inv_nu * (jnp.sum(acc_ref[...]) * inv_n)


def _mean_kernel(params_ref, dist_ref, out_ref, acc_ref):
    # params (SMEM): [R^2, 1/nu, 1/N]
    i = pl.program_id(0)

    @pl.when(i == 0)
    def _init():
        acc_ref[...] = jnp.zeros_like(acc_ref)

    acc_ref[...] += dist_ref[...].astype(jnp.float32)

    @pl.when(i == pl.num_programs(0) - 1)
    def _finalize():
        inv_n = params_ref[2]
        out_ref[0, 0] = jnp.sum(acc_ref[...]) * inv_n


def _round_up(x, m):
    return ((x + m - 1) // m) * m


def one_class_loss(dist, R, objective, nu, *, block_rows=1024):
    """Pallas implementation of OneClassLoss.forward.

    Args:
      dist: jnp array (any shape) of per-sample squared distances; streamed in native dtype.
      R: radius (python float or traced scalar).
      objective: 'soft-boundary' or anything else ('one-class').
      nu: nu hyperparameter (python float or traced scalar).
      block_rows: rows of 128 lanes per grid step (~block_rows*128*itemsize bytes per tile).
    Returns:
      scalar f32 loss.
    """
    dist = jnp.asarray(dist)                       # keep native dtype (e.g. bf16)
    n = int(dist.size)
    flat = dist.reshape(-1)

    # Dense (rows, 128) layout; row blocking respects the dtype's sublane packing
    # (f32 -> 8, bf16 -> 16, 8-bit -> 32 rows).
    itemsize = jnp.dtype(dist.dtype).itemsize
    row_align = 8 * max(1, 4 // itemsize)
    rows = pl.cdiv(n, _LANES)
    br = min(_round_up(block_rows, row_align), _round_up(rows, row_align))
    total_rows = _round_up(rows, br)

    pad = total_rows * _LANES - n
    if pad:
        # Zero padding is exact for both branches (see module docstring).
        flat = jnp.pad(flat, (0, pad))
    dist2d = flat.reshape(total_rows, _LANES)
    num_blocks = total_rows // br

    rsq = jnp.asarray(R, jnp.float32) ** 2
    inv_nu = 1.0 / jnp.asarray(nu, jnp.float32)
    inv_n = jnp.float32(1.0 / float(n))
    params = jnp.stack([rsq, inv_nu, inv_n]).astype(jnp.float32)

    kernel = _soft_boundary_kernel if objective == 'soft-boundary' else _mean_kernel

    out = pl.pallas_call(
        kernel,
        out_shape=jax.ShapeDtypeStruct((1, 1), jnp.float32),
        grid_spec=pltpu.PrefetchScalarGridSpec(
            num_scalar_prefetch=0,
            grid=(num_blocks,),
            in_specs=[
                pl.BlockSpec(memory_space=pltpu.MemorySpace.SMEM),   # [R^2, 1/nu, 1/N]
                pl.BlockSpec((br, _LANES), lambda i: (i, 0)),        # lane-dense dist tiles
            ],
            out_specs=pl.BlockSpec(memory_space=pltpu.MemorySpace.SMEM),  # scalar result
            scratch_shapes=[pltpu.VMEM((br, _LANES), jnp.float32)],       # partial-sum acc
        ),
        compiler_params=pltpu.CompilerParams(
            dimension_semantics=("arbitrary",),                      # carried accumulator
        ),
    )(params, dist2d)
    return out[0, 0]


def _reference(dist, R, objective, nu):
    d = jnp.asarray(dist, jnp.float32)
    if objective == 'soft-boundary':
        scores = d - R ** 2
        return R ** 2 + (1.0 / nu) * jnp.mean(jnp.maximum(scores, 0.0))
    return jnp.mean(d)


if __name__ == "__main__":
    key = jax.random.PRNGKey(0)
    k1, k2 = jax.random.split(key)

    R, nu = 0.8, 0.1

    # Case 1: small f32 batch shaped like a conv feature map (2, 4, 16, 16) -> single block.
    d1 = jax.random.uniform(k1, (2, 4, 16, 16), dtype=jnp.float32, minval=0.0, maxval=2.0)
    sb1 = one_class_loss(d1, R, 'soft-boundary', nu)
    oc1 = one_class_loss(d1, R, 'one-class', nu)
    jax.block_until_ready((sb1, oc1))
    assert jnp.allclose(sb1, _reference(d1, R, 'soft-boundary', nu), rtol=1e-5, atol=1e-5), sb1
    assert jnp.allclose(oc1, _reference(d1, R, 'one-class', nu), rtol=1e-5, atol=1e-5), oc1

    # Case 2: native-bf16 input with a ragged tail and small block_rows -> multi-step grid
    # exercising the zero-padded tail and the carried accumulator.
    n2 = 24_500
    d2 = jax.random.uniform(k2, (n2,), dtype=jnp.float32, minval=0.0, maxval=2.0)
    d2_bf16 = d2.astype(jnp.bfloat16)
    sb2 = one_class_loss(d2_bf16, R, 'soft-boundary', nu, block_rows=16)
    oc2 = one_class_loss(d2_bf16, R, 'one-class', nu, block_rows=16)
    jax.block_until_ready((sb2, oc2))
    assert jnp.allclose(sb2, _reference(d2_bf16, R, 'soft-boundary', nu),
                        rtol=1e-3, atol=1e-3), sb2
    assert jnp.allclose(oc2, _reference(d2_bf16, R, 'one-class', nu),
                        rtol=1e-3, atol=1e-3), oc2

    # TODO(synk): for tiny N the right optimization is fusing this reduction into the
    # producer kernel that computes `dist`; a standalone launch cannot amortize that here.
    print("KERNEL_OK")
</pallas_src>

<mosaic_0001>
module attributes {stable_mosaic.version = 11 : i64} {
  func.func @_soft_boundary_kernel(%arg0: i32, %arg1: memref<3xf32, #tpu.memory_space<smem>>, %arg2: memref<16x128xf32, #tpu.memory_space<vmem>>, %arg3: memref<1x1xf32, #tpu.memory_space<smem>>, %arg4: memref<16x128xf32, #tpu.memory_space<vmem>>) attributes {dimension_semantics = [#tpu.dimension_semantics<arbitrary>], iteration_bounds = array<i64: 1>, scalar_prefetch = 0 : i64, scratch_operands = 1 : i64, tpu.core_type = #tpu.core_type<tc>, window_params = [{transform_indices = @transform_0, window_bounds = array<i64: 3>}, {transform_indices = @transform_1, window_bounds = array<i64: 16, 128>}, {transform_indices = @transform_2, window_bounds = array<i64: 1, 1>}]} {
    %c0_i32 = arith.constant 0 : i32
    %0 = arith.cmpi eq, %arg0, %c0_i32 : i32
    %1 = arith.extui %0 : i1 to i32
    %c0_i32_0 = arith.constant 0 : i32
    %2 = arith.cmpi ne, %1, %c0_i32_0 : i32
    scf.if %2 {
      %cst_9 = arith.constant 0.000000e+00 : f32
      %15 = vector.broadcast %cst_9 : f32 to vector<16x128xf32>
      %c0_10 = arith.constant 0 : index
      %c0_11 = arith.constant 0 : index
      %16 = vector.load %arg4[%c0_10, %c0_11] : memref<16x128xf32, #tpu.memory_space<vmem>>, vector<16x128xf32>
      tpu.vector_store %arg4[%c0_10, %c0_11], %15 {strides = array<i32>} : memref<16x128xf32, #tpu.memory_space<vmem>>, vector<16x128xf32>,
    } else {
    }
    %c0 = arith.constant 0 : index
    %3 = memref.load %arg1[%c0] : memref<3xf32, #tpu.memory_space<smem>>
    %c0_1 = arith.constant 0 : index
    %c0_2 = arith.constant 0 : index
    %4 = vector.load %arg2[%c0_1, %c0_2] : memref<16x128xf32, #tpu.memory_space<vmem>>, vector<16x128xf32>
    %c0_3 = arith.constant 0 : index
    %c0_4 = arith.constant 0 : index
    %5 = vector.load %arg4[%c0_3, %c0_4] : memref<16x128xf32, #tpu.memory_space<vmem>>, vector<16x128xf32>
    %6 = vector.broadcast %3 : f32 to vector<16x128xf32>
    %7 = arith.subf %4, %6 : vector<16x128xf32>
    %cst = arith.constant 0.000000e+00 : f32
    %8 = vector.broadcast %cst : f32 to vector<16x128xf32>
    %9 = arith.maximumf %7, %8 : vector<16x128xf32>
    %10 = arith.addf %5, %9 : vector<16x128xf32>
    %c0_5 = arith.constant 0 : index
    %c0_6 = arith.constant 0 : index
    %11 = vector.load %arg4[%c0_5, %c0_6] : memref<16x128xf32, #tpu.memory_space<vmem>>, vector<16x128xf32>
    tpu.vector_store %arg4[%c0_5, %c0_6], %10 {strides = array<i32>} : memref<16x128xf32, #tpu.memory_space<vmem>>, vector<16x128xf32>,
    %c0_i32_7 = arith.constant 0 : i32
    %12 = arith.cmpi eq, %arg0, %c0_i32_7 : i32
    %13 = arith.extui %12 : i1 to i32
    %c0_i32_8 = arith.constant 0 : i32
    %14 = arith.cmpi ne, %13, %c0_i32_8 : i32
    scf.if %14 {
      %c1 = arith.constant 1 : index
      %15 = memref.load %arg1[%c1] : memref<3xf32, #tpu.memory_space<smem>>
      %c2 = arith.constant 2 : index
      %16 = memref.load %arg1[%c2] : memref<3xf32, #tpu.memory_space<smem>>
      %c0_9 = arith.constant 0 : index
      %c0_10 = arith.constant 0 : index
      %17 = vector.load %arg4[%c0_9, %c0_10] : memref<16x128xf32, #tpu.memory_space<vmem>>, vector<16x128xf32>
      %18 = vector.shape_cast %17 : vector<16x128xf32> to vector<1x16x128xf32>
      %cst_11 = arith.constant dense<0.000000e+00> : vector<1xf32>
      %19 = vector.multi_reduction <add>, %18, %cst_11 [1, 2] : vector<1x16x128xf32> to vector<1xf32>
      %20 = vector.shape_cast %19 : vector<1xf32> to vector<1x1x1xf32>
      %21 = vector.extract %20[0, 0, 0] : f32 from vector<1x1x1xf32>
      %22 = arith.mulf %21, %16 : f32
      %23 = arith.mulf %15, %22 : f32
      %24 = arith.addf %3, %23 : f32
      %c0_12 = arith.constant 0 : index
      %c0_13 = arith.constant 0 : index
      %25 = memref.load %arg3[%c0_12, %c0_13] : memref<1x1xf32, #tpu.memory_space<smem>>
      memref.store %24, %arg3[%c0_12, %c0_13] : memref<1x1xf32, #tpu.memory_space<smem>>
    } else {
    }
    return
  }
  func.func @transform_0(%arg0: i32) -> i32 {
    %c0_i32 = arith.constant 0 : i32
    %c0_i32_0 = arith.constant 0 : i32
    return %c0_i32 : i32
  }
  func.func @transform_1(%arg0: i32) -> (i32, i32) {
    %c0_i32 = arith.constant 0 : i32
    %c0_i32_0 = arith.constant 0 : i32
    return %arg0, %c0_i32 : i32, i32
  }
  func.func @transform_2(%arg0: i32) -> (i32, i32) {
    %c0_i32 = arith.constant 0 : i32
    %c0_i32_0 = arith.constant 0 : i32
    %c0_i32_1 = arith.constant 0 : i32
    return %c0_i32, %c0_i32_0 : i32, i32
  }
}

</mosaic_0001>

<bundles_post_ra>
// kernel: tpu_custom_call.1
= control target key start
LH: loop header
LB: loop body
LE: loop exit
PB: predicated region body
PF: predicated region fallthrough
CT: control target
= control target key end

     0   :  { %7 = vsyncpa [#allocation5], 0  ;;  %s192_s0 = inlined_call_operand.hbm [shape: f32[3], index: 0, kind: input, shape index: {}]   ;;  %s193_s1 = inlined_call_operand.hbm [shape: f32[16,128], index: 1, kind: input, shape index: {}]   ;;  %s194_s2 = inlined_call_operand.hbm [shape: f32[1,1], index: 2, kind: output, shape index: {}]  }
   0x1   :  { %8 = vsyncpa [#allocation4], 0 }
   0x2   :  { %9 = vsyncpa [#allocation6], 0  ;;  %s15_s11 = sshll.u32 %s192_s0, 4  ;;  %s23_s14 = sshll.u32 %s193_s1, 4  ;;  %s16_s11 = int_to_ptr.hbm [resolvable:$true] %s15_s11  ;;  %s24_s14 = int_to_ptr.hbm [resolvable:$true] %s23_s14 }
   0x3   :  { %s163_s15 = smov [#allocation3]   ;;  %s164_s16 = smov [#allocation7]  }
   0x4   :  { %18 = dma.hbm_to_smem %s16_s11, 16, %s163_s15, [#allocation5]  }
   0x5   :  { %s25_s17 = sshll.u32 %s164_s16, 4  ;;  %s165_s18 = smov 128   ;;  %s26_s17 = int_to_ptr.vmem [resolvable:$true] %s25_s17 }
   0x6   :  { %s166_s19 = smov 8  }
   0x7   :  { %31 = dma.hbm_to_vmem [thread:$0]  %s24_s14, 256, %s26_s17, [#allocation4], %s165_s18, %s165_s18, %s166_s19  }
   0x8   :  { %157 = dma.done.wait [#allocation5], 16  }
   0x9   :  { %158 = vsyncadd [#allocation5], 4294967280 }
   0xa   :  { %159 = dma.done.wait [#allocation4], 256  }
   0xb   :  { %160 = vsyncadd [#allocation4], 4294967040 }
   0xc   :  { %40 = sfence }
   0xd   :  { %s47_s0 = sld [smem:[#allocation3]]  ;;  %v48_v0 = vld [vmem:[#allocation7] sm:$0xff]  ;;  %v49_v1 = vld [vmem:[#allocation7 + $0x8] sm:$0xff]  ;;  %s88_s25 = sshll.u32 %s194_s2, 4  ;;  %s89_s25 = int_to_ptr.hbm [resolvable:$true] %s88_s25 }
   0xe   :  { %s101_s1 = sld [smem:[#allocation3 + $0x2]]  ;;  %s167_s28 = smov [#allocation8]  }
   0xf   :  { %s100_s20 = sld [smem:[#allocation3 + $0x1]] }
  0x13   :  { %v52_v2 = vstv %s47_s0 }
  0x14   :  { %v53_v3 = vsub.f32 %v48_v0, %v52_v2  ;;  %v54_v4 = vsub.f32 %v49_v1, %v52_v2 }
  0x16   :  { %v55_v5 = vmax.f32 %v53_v3, 0.0  ;;  %v56_v6 = vmax.f32 %v54_v4, 0.0 }
  0x18   :  { %v68_v7 = vadd.f32 %v56_v6, %v55_v5 }
  0x1a   :  { %69 = vadd.xlane.f32.xlu0 %v68_v7 }
  0x8d   :  { %v70_v8 = vpop.xlane.xlu0 %69 }
  0x8e   :  { %v71_v9 = vrot.slane %v70_v8, 4 }
  0x90   :  { %v72_v10 = vadd.f32 %v71_v9, %v70_v8 }
  0x92   :  { %v73_v11 = vrot.slane %v72_v10, 2 }
  0x94   :  { %v74_v12 = vadd.f32 %v73_v11, %v72_v10 }
  0x96   :  { %v75_v13 = vrot.slane %v74_v12, 1 }
  0x98   :  { %v76_v14 = vadd.f32 %v75_v13, %v74_v12 }
  0x9a   :  { %102 = vpush %v76_v14 }
  0xcb   :  { %s103_s21 = spop %102 }
  0xcc   :  { %s78_s22 = smul.f32 %s103_s21, %s101_s1 }
  0xce   :  { %s79_s26 = smul.f32 %s100_s20, %s78_s22 }
  0xd0   :  { %s80_s27 = sadd.f32 %s79_s26, %s47_s0 }
  0xd2   :  { %82 = sst [smem:[#allocation8]] %s80_s27 }
  0xd3   :  { %91 = dma.smem_to_hbm %s167_s28, 16, %s89_s25, [#allocation6]  }
  0xd4   :  { %161 = dma.done.wait [#allocation6], 16  }
  0xd5   :  { %162 = vsyncadd [#allocation6], 4294967280 }
  0xd6   :  { %96 = sfence }
  0xd7   :  { %97 = vsyncpa [#allocation4], 1 }
  0xd8   :  { %98 = vsyncpa [#allocation5], 1 }
  0xd9   :  { %99 = vsyncpa [#allocation6], 1 }

</bundles_post_ra>
